<compile_context>
chip_gen: v5e
topology: v5e:2x2
jax: 0.10.0
libtpu: 0.0.40
codegen_flags: <defaults>
</compile_context>

<pallas_src>
import jax
import jax.numpy as jnp
from jax import lax
from jax.experimental import pallas as pl
from jax.experimental.pallas import tpu as pltpu


_LANE = 128
_SUBLANE = 8
_MAX_BATCH_TILE = 256     # v6e/v7x MXU is 256-wide; also fine on v5e
_NEG_BIG = -1.0e30        # mask for padded vocab columns


def _round_up(x, m):
    return ((x + m - 1) // m) * m


def _decode_kernel(h0_ref, emb_ref, wg_ref, b_ref, wout_ref, bout_ref,
                   out_hbm, stage_ref, sem_ref):
    """Runs the full T-step greedy decode for one batch tile, streaming the
    per-step (Bt, V) log-prob slab to HBM via a 2-slot staging buffer."""
    Bt, H = h0_ref.shape
    Vp = emb_ref.shape[0]
    T = out_hbm.shape[1] // Vp

    row0 = pl.program_id(0) * Bt

    # ---- loop-invariant values hoisted out of the decode loop.
    lane_iota = lax.broadcasted_iota(jnp.int32, (Bt, Vp), 1)
    bias = b_ref[...]        # (1, 4H) f32
    bout = bout_ref[...]     # (1, Vp) f32 (padded cols hold _NEG_BIG)

    h0 = h0_ref[...]                          # (Bt, H) f32: image feature
    c0 = jnp.zeros((Bt, H), jnp.float32)      # c0 = 0
    tok0 = jnp.ones((Bt, 1), jnp.int32)       # start token id = 1

    def out_copy(slot, col_start):
        return pltpu.make_async_copy(
            stage_ref.at[slot],
            out_hbm.at[pl.ds(row0, Bt), pl.ds(col_start, Vp)],
            sem_ref.at[slot])

    def step(t, carry):
        h, c, tok = carry
        slot = t % 2

        # --- embedding lookup: exact one-hot row select on the bf16 MXU path
        # (0/1 one-hot x bf16 table with f32 accumulation selects rows exactly).
        # TODO(synk): an SMEM-indexed dynamic row gather would remove the
        # O(Bt*V*H) one-hot matmul at large V; kept on the proven MXU path.
        onehot = (lane_iota == tok).astype(jnp.bfloat16)               # (Bt, Vp)
        x = jnp.dot(onehot, emb_ref[...],
                    preferred_element_type=jnp.float32)                # (Bt, H)
        # TODO(synk): nn.Dropout(p=0.3) is identity in eval mode (not applied).

        # --- fused single-layer LSTM cell (PyTorch gate order i, f, g, o):
        #     [x, h] @ [W_ih^T ; W_hh^T]  -> one MXU matmul per step.
        xh = jnp.concatenate(
            [x.astype(jnp.bfloat16), h.astype(jnp.bfloat16)], axis=-1)  # (Bt, 2H)
        gates = jnp.dot(xh, wg_ref[...],
                        preferred_element_type=jnp.float32) + bias      # (Bt, 4H)
        i_g = jax.nn.sigmoid(gates[:, 0 * H:1 * H])   # lane-aligned (H % 128 == 0)
        f_g = jax.nn.sigmoid(gates[:, 1 * H:2 * H])
        g_g = jnp.tanh(gates[:, 2 * H:3 * H])
        o_g = jax.nn.sigmoid(gates[:, 3 * H:4 * H])
        c_new = f_g * c + i_g * g_g
        h_new = o_g * jnp.tanh(c_new)

        # --- output projection H -> Vp (bf16 MXU, f32 accumulate).
        logits = jnp.dot(h_new.astype(jnp.bfloat16), wout_ref[...],
                         preferred_element_type=jnp.float32) + bout     # (Bt, Vp)

        # --- greedy next token (first max index, like torch.topk(1)).
        mx = jnp.max(logits, axis=-1, keepdims=True)
        cand = jnp.where(logits == mx, lane_iota, Vp)
        tok_new = jnp.min(cand, axis=-1, keepdims=True)

        # --- log_softmax over vocab (f32 exp/log on EUP).
        lse = mx + jnp.log(jnp.sum(jnp.exp(logits - mx), axis=-1, keepdims=True))

        # --- stream this step's (Bt, Vp) slab to HBM, double-buffered: wait
        # for the DMA that used this slot two steps ago before reusing it.
        @pl.when(t >= 2)
        def _():
            out_copy(slot, 0).wait()          # only size/semaphore matter here
        stage_ref[pl.ds(slot, 1), :, :] = (logits - lse)[None, :, :]
        out_copy(slot, t * Vp).start()

        return (h_new, c_new, tok_new)

    lax.fori_loop(0, T, step, (h0, c0, tok0))

    # Drain outstanding output DMAs before this grid step finishes.
    for s in range(min(T, 2)):
        out_copy((T - 1 - s) % 2, 0).wait()


def _vmem_capacity_bytes():
    try:
        return int(pltpu.get_tpu_info().vmem_capacity_bytes)
    except Exception:
        return 64 << 20          # conservative fallback (v7x per-TC VMEM)


def _nbytes(a):
    return a.size * a.dtype.itemsize


def rnn_decoder_forward(image_features, params, *, max_length):
    """Greedy decode; returns log-probs of shape (B, max_length, vocab_size)."""
    B, _, H = image_features.shape
    emb, w_ih, w_hh, b_ih, b_hh, w_out, b_out = params
    V = emb.shape[0]
    if H % _LANE != 0:
        raise ValueError("hid_dim must be a multiple of 128 "
                         "(lane-aligned i/f/g/o gate slices).")
    Vp = _round_up(V, _LANE)
    T = max_length

    # ---- weight prep: bf16 MXU operands, f32 biases (added post-accumulation).
    emb_bf = jnp.pad(emb, ((0, Vp - V), (0, 0))).astype(jnp.bfloat16)        # (Vp, H)
    w_gates = jnp.concatenate([w_ih.T, w_hh.T], axis=0).astype(jnp.bfloat16)  # (2H, 4H)
    bias = (b_ih + b_hh).reshape(1, 4 * H).astype(jnp.float32)               # (1, 4H)
    wout_t = jnp.pad(w_out.T, ((0, 0), (0, Vp - V))).astype(jnp.bfloat16)    # (H, Vp)
    bout = jnp.pad(b_out.astype(jnp.float32), (0, Vp - V),
                   constant_values=_NEG_BIG).reshape(1, Vp)                  # (1, Vp)

    resident = (_nbytes(emb_bf) + _nbytes(w_gates) + _nbytes(bias)
                + _nbytes(wout_t) + _nbytes(bout))
    capacity = _vmem_capacity_bytes()

    # ---- adaptive batch tile: as large as VMEM allows (better MXU M-dim),
    # capped at 256 (v6e/v7x MXU width), padded to the f32 sublane tile.
    def _footprint(bt_):
        return (resident
                + 2 * bt_ * Vp * 4            # 2-slot output staging scratch
                + 2 * bt_ * H * 4             # double-buffered h0 input block
                + 4 * bt_ * Vp * 4            # live vocab-wide loop temporaries
                + 10 * bt_ * H * 4            # h / c / x / gates temporaries
                + (8 << 20))                  # headroom
    bt = min(_round_up(B, _SUBLANE), _MAX_BATCH_TILE)
    while bt > _SUBLANE and _footprint(bt) > capacity:
        bt = max(_SUBLANE, _round_up(bt // 2, _SUBLANE))
    # TODO(synk): if the bf16 weights alone exceed per-TC VMEM (huge V*H),
    # emb / W_out should stay in HBM (pl.ANY) and be streamed in vocab tiles.

    n_blocks = pl.cdiv(B, bt)
    b_pad = n_blocks * bt

    # h0 <- image feature token 0; padded rows are zeros and sliced off below.
    h0 = image_features[:, 0, :].astype(jnp.float32)
    h0 = jnp.pad(h0, ((0, b_pad - B), (0, 0)))

    vmem_limit = int(min(max(_footprint(bt), 32 << 20), capacity))

    # Grid-invariant weights: whole-array, single-copy VMEM residents.
    resident_spec = pl.BlockSpec(memory_space=pltpu.MemorySpace.VMEM)

    out_flat = pl.pallas_call(
        _decode_kernel,
        # Batch-major output with time*vocab flattened on the last axis so the
        # per-step DMA destination is a clean (bt, Vp) dynamic slice; the final
        # reshape to (B_pad, T, Vp) is a free row-major view (no transpose).
        out_shape=jax.ShapeDtypeStruct((b_pad, T * Vp), jnp.float32),
        grid=(n_blocks,),
        in_specs=[
            pl.BlockSpec((bt, H), lambda b: (b, 0)),   # h0: per batch tile
            resident_spec,                             # embedding table (bf16)
            resident_spec,                             # [W_ih^T ; W_hh^T] (bf16)
            resident_spec,                             # b_ih + b_hh (f32)
            resident_spec,                             # W_out^T (bf16)
            resident_spec,                             # b_out (f32, pad = -1e30)
        ],
        out_specs=pl.BlockSpec(memory_space=pl.ANY),   # raw HBM, written via DMA
        scratch_shapes=[
            pltpu.VMEM((2, bt, Vp), jnp.float32),      # 2-slot output staging
            pltpu.SemaphoreType.DMA((2,)),
        ],
        compiler_params=pltpu.CompilerParams(
            dimension_semantics=("parallel",),         # batch tiles -> 2 TCs on v7x
            vmem_limit_bytes=vmem_limit,
            has_side_effects=True),
    )(h0, emb_bf, w_gates, bias, wout_t, bout)

    out = out_flat.reshape(b_pad, T, Vp)
    return out[:B, :, :V]


def init_params(key, vocab_size, hid_dim):
    ks = jax.random.split(key, 7)
    scale = 0.1
    emb = scale * jax.random.normal(ks[0], (vocab_size, hid_dim), jnp.float32)
    w_ih = scale * jax.random.normal(ks[1], (4 * hid_dim, hid_dim), jnp.float32)
    w_hh = scale * jax.random.normal(ks[2], (4 * hid_dim, hid_dim), jnp.float32)
    b_ih = scale * jax.random.normal(ks[3], (4 * hid_dim,), jnp.float32)
    b_hh = scale * jax.random.normal(ks[4], (4 * hid_dim,), jnp.float32)
    w_out = scale * jax.random.normal(ks[5], (vocab_size, hid_dim), jnp.float32)
    b_out = scale * jax.random.normal(ks[6], (vocab_size,), jnp.float32)
    return (emb, w_ih, w_hh, b_ih, b_hh, w_out, b_out)


if __name__ == "__main__":
    # Small shapes consistent with the module (1 LSTM layer); H and V are
    # lane-aligned, B=4 exercises the pad-to-sublane batch path.
    B, S, H, V, T = 4, 5, 128, 256, 8

    key = jax.random.PRNGKey(0)
    pkey, xkey = jax.random.split(key)
    params = init_params(pkey, vocab_size=V, hid_dim=H)
    image_features = jax.random.normal(xkey, (B, S, H), jnp.float32)

    log_probs = rnn_decoder_forward(image_features, params, max_length=T)
    log_probs = jax.block_until_ready(log_probs)

    assert log_probs.shape == (B, T, V)
    assert log_probs.dtype == jnp.float32
    assert bool(jnp.all(jnp.isfinite(log_probs)))
    # log-softmax rows must normalize (f32 exactness independent of bf16 MXU).
    assert jnp.allclose(jnp.sum(jnp.exp(log_probs), axis=-1), 1.0, atol=1e-3)
    print("KERNEL_OK")
</pallas_src>

<mosaic_0001>
module attributes {stable_mosaic.version = 11 : i64} {
  func.func @_decode_kernel(%arg0: i32, %arg1: memref<8x128xf32, #tpu.memory_space<vmem>>, %arg2: memref<256x128xbf16, #tpu.memory_space<vmem>>, %arg3: memref<256x512xbf16, #tpu.memory_space<vmem>>, %arg4: memref<1x512xf32, #tpu.memory_space<vmem>>, %arg5: memref<128x256xbf16, #tpu.memory_space<vmem>>, %arg6: memref<1x256xf32, #tpu.memory_space<vmem>>, %arg7: memref<8x2048xf32, #tpu.memory_space<any>>, %arg8: memref<2x8x256xf32, #tpu.memory_space<vmem>>, %arg9: memref<2x!tpu.dma_semaphore, #tpu.memory_space<semaphore_mem>>) attributes {dimension_semantics = [#tpu.dimension_semantics<parallel>], iteration_bounds = array<i64: 1>, scalar_prefetch = 0 : i64, scratch_operands = 2 : i64, tpu.core_type = #tpu.core_type<tc>, window_params = [{transform_indices = @transform_0, window_bounds = array<i64: 8, 128>}, {pipeline_mode = #tpu.pipeline_mode<synchronous>, transform_indices = @transform_1, window_bounds = array<i64: 256, 128>}, {pipeline_mode = #tpu.pipeline_mode<synchronous>, transform_indices = @transform_2, window_bounds = array<i64: 256, 512>}, {pipeline_mode = #tpu.pipeline_mode<synchronous>, transform_indices = @transform_3, window_bounds = array<i64: 1, 512>}, {pipeline_mode = #tpu.pipeline_mode<synchronous>, transform_indices = @transform_4, window_bounds = array<i64: 128, 256>}, {pipeline_mode = #tpu.pipeline_mode<synchronous>, transform_indices = @transform_5, window_bounds = array<i64: 1, 256>}, {}]} {
    %c8_i32 = arith.constant 8 : i32
    %0 = arith.muli %arg0, %c8_i32 : i32
    %1 = tpu.iota {dimensions = array<i32: 1>} : vector<8x256xi32>
    %c0 = arith.constant 0 : index
    %c0_0 = arith.constant 0 : index
    %2 = vector.load %arg4[%c0, %c0_0] : memref<1x512xf32, #tpu.memory_space<vmem>>, vector<1x512xf32>
    %c0_1 = arith.constant 0 : index
    %c0_2 = arith.constant 0 : index
    %3 = vector.load %arg6[%c0_1, %c0_2] : memref<1x256xf32, #tpu.memory_space<vmem>>, vector<1x256xf32>
    %c0_3 = arith.constant 0 : index
    %c0_4 = arith.constant 0 : index
    %4 = vector.load %arg1[%c0_3, %c0_4] : memref<8x128xf32, #tpu.memory_space<vmem>>, vector<8x128xf32>
    %cst = arith.constant 0.000000e+00 : f32
    %5 = vector.broadcast %cst : f32 to vector<8x128xf32>
    %c1_i32 = arith.constant 1 : i32
    %6 = vector.broadcast %c1_i32 : i32 to vector<8x1xi32>
    %c0_i32 = arith.constant 0 : i32
    %c8_i32_5 = arith.constant 8 : i32
    %7 = arith.addi %c0_i32, %c8_i32_5 : i32
    %c1_i32_6 = arith.constant 1 : i32
    %8:3 = scf.for %arg10 = %c0_i32 to %7 step %c1_i32_6 iter_args(%arg11 = %4, %arg12 = %5, %arg13 = %6) -> (vector<8x128xf32>, vector<8x128xf32>, vector<8x1xi32>)  : i32 {
      %c2_i32 = arith.constant 2 : i32
      %c0_i32_18 = arith.constant 0 : i32
      %19 = arith.cmpi eq, %c2_i32, %c0_i32_18 : i32
      %c1_i32_19 = arith.constant 1 : i32
      %20 = arith.select %19, %c1_i32_19, %c2_i32 : i32
      %21 = arith.remsi %arg10, %20 : i32
      %c0_i32_20 = arith.constant 0 : i32
      %22 = arith.cmpi ne, %21, %c0_i32_20 : i32
      %c0_i32_21 = arith.constant 0 : i32
      %23 = arith.cmpi slt, %21, %c0_i32_21 : i32
      %c0_i32_22 = arith.constant 0 : i32
      %24 = arith.cmpi slt, %20, %c0_i32_22 : i32
      %25 = arith.xori %23, %24 : i1
      %26 = arith.andi %25, %22 : i1
      %27 = arith.addi %21, %20 : i32
      %28 = arith.select %26, %27, %21 : i32
      %29 = vector.broadcast %arg13 : vector<8x1xi32> to vector<8x256xi32>
      %30 = arith.cmpi eq, %1, %29 : vector<8x256xi32>
      %31 = arith.extui %30 : vector<8x256xi1> to vector<8x256xi32>
      %32 = arith.sitofp %31 : vector<8x256xi32> to vector<8x256xf32>
      %33 = arith.truncf %32 : vector<8x256xf32> to vector<8x256xbf16>
      %c0_23 = arith.constant 0 : index
      %c0_24 = arith.constant 0 : index
      %34 = vector.load %arg2[%c0_23, %c0_24] : memref<256x128xbf16, #tpu.memory_space<vmem>>, vector<256x128xbf16>
      %cst_25 = arith.constant dense<0.000000e+00> : vector<8x128xf32>
      %35 = tpu.matmul %33, %34, %cst_25 {dimension_numbers = #tpu.dot_dimension_numbers<[1], [0], [0], [1], [0, 0, 1, 1], [], []>} : vector<8x256xbf16>, vector<256x128xbf16>, vector<8x128xf32> -> vector<8x128xf32>
      %36 = arith.truncf %35 : vector<8x128xf32> to vector<8x128xbf16>
      %37 = arith.truncf %arg11 : vector<8x128xf32> to vector<8x128xbf16>
      %38 = tpu.concatenate %36, %37 in 1 : vector<8x128xbf16>, vector<8x128xbf16> -> vector<8x256xbf16>
      %c0_26 = arith.constant 0 : index
      %c0_27 = arith.constant 0 : index
      %39 = vector.load %arg3[%c0_26, %c0_27] : memref<256x512xbf16, #tpu.memory_space<vmem>>, vector<256x512xbf16>
      %cst_28 = arith.constant dense<0.000000e+00> : vector<8x512xf32>
      %40 = tpu.matmul %38, %39, %cst_28 {dimension_numbers = #tpu.dot_dimension_numbers<[1], [0], [0], [1], [0, 0, 1, 1], [], []>} : vector<8x256xbf16>, vector<256x512xbf16>, vector<8x512xf32> -> vector<8x512xf32>
      %41 = vector.broadcast %2 : vector<1x512xf32> to vector<8x512xf32>
      %42 = arith.addf %40, %41 : vector<8x512xf32>
      %43 = vector.extract_strided_slice %42 {offsets = [0, 0], sizes = [8, 128], strides = [1, 1]} : vector<8x512xf32> to vector<8x128xf32>
      %44 = arith.negf %43 : vector<8x128xf32>
      %45 = math.exp %44 : vector<8x128xf32>
      %cst_29 = arith.constant 1.000000e+00 : f32
      %46 = vector.broadcast %cst_29 : f32 to vector<8x128xf32>
      %47 = arith.addf %46, %45 : vector<8x128xf32>
      %48 = arith.divf %46, %47 : vector<8x128xf32>
      %49 = vector.extract_strided_slice %42 {offsets = [0, 128], sizes = [8, 128], strides = [1, 1]} : vector<8x512xf32> to vector<8x128xf32>
      %50 = arith.negf %49 : vector<8x128xf32>
      %51 = math.exp %50 : vector<8x128xf32>
      %cst_30 = arith.constant 1.000000e+00 : f32
      %52 = vector.broadcast %cst_30 : f32 to vector<8x128xf32>
      %53 = arith.addf %52, %51 : vector<8x128xf32>
      %54 = arith.divf %52, %53 : vector<8x128xf32>
      %55 = vector.extract_strided_slice %42 {offsets = [0, 256], sizes = [8, 128], strides = [1, 1]} : vector<8x512xf32> to vector<8x128xf32>
      %56 = math.tanh %55 : vector<8x128xf32>
      %57 = vector.extract_strided_slice %42 {offsets = [0, 384], sizes = [8, 128], strides = [1, 1]} : vector<8x512xf32> to vector<8x128xf32>
      %58 = arith.negf %57 : vector<8x128xf32>
      %59 = math.exp %58 : vector<8x128xf32>
      %cst_31 = arith.constant 1.000000e+00 : f32
      %60 = vector.broadcast %cst_31 : f32 to vector<8x128xf32>
      %61 = arith.addf %60, %59 : vector<8x128xf32>
      %62 = arith.divf %60, %61 : vector<8x128xf32>
      %63 = arith.mulf %54, %arg12 : vector<8x128xf32>
      %64 = arith.mulf %48, %56 : vector<8x128xf32>
      %65 = arith.addf %63, %64 : vector<8x128xf32>
      %66 = math.tanh %65 : vector<8x128xf32>
      %67 = arith.mulf %62, %66 : vector<8x128xf32>
      %68 = arith.truncf %67 : vector<8x128xf32> to vector<8x128xbf16>
      %c0_32 = arith.constant 0 : index
      %c0_33 = arith.constant 0 : index
      %69 = vector.load %arg5[%c0_32, %c0_33] : memref<128x256xbf16, #tpu.memory_space<vmem>>, vector<128x256xbf16>
      %cst_34 = arith.constant dense<0.000000e+00> : vector<8x256xf32>
      %70 = tpu.matmul %68, %69, %cst_34 {dimension_numbers = #tpu.dot_dimension_numbers<[1], [0], [0], [1], [0, 0, 1, 1], [], []>} : vector<8x128xbf16>, vector<128x256xbf16>, vector<8x256xf32> -> vector<8x256xf32>
      %71 = vector.broadcast %3 : vector<1x256xf32> to vector<8x256xf32>
      %72 = arith.addf %70, %71 : vector<8x256xf32>
      %cst_35 = arith.constant dense<0xFF800000> : vector<8xf32>
      %73 = vector.multi_reduction <maximumf>, %72, %cst_35 [1] : vector<8x256xf32> to vector<8xf32>
      %74 = vector.shape_cast %73 : vector<8xf32> to vector<8x1xf32>
      %75 = vector.broadcast %74 : vector<8x1xf32> to vector<8x256xf32>
      %76 = arith.cmpf oeq, %72, %75 : vector<8x256xf32>
      %c256_i32 = arith.constant 256 : i32
      %77 = vector.broadcast %c256_i32 : i32 to vector<8x256xi32>
      %78 = arith.select %76, %1, %77 : vector<8x256xi1>, vector<8x256xi32>
      %cst_36 = arith.constant dense<2147483647> : vector<8xi32>
      %79 = vector.multi_reduction <minsi>, %78, %cst_36 [1] : vector<8x256xi32> to vector<8xi32>
      %80 = vector.shape_cast %79 : vector<8xi32> to vector<8x1xi32>
      %81 = vector.broadcast %74 : vector<8x1xf32> to vector<8x256xf32>
      %82 = arith.subf %72, %81 : vector<8x256xf32>
      %83 = math.exp %82 : vector<8x256xf32>
      %cst_37 = arith.constant dense<0.000000e+00> : vector<8xf32>
      %84 = vector.multi_reduction <add>, %83, %cst_37 [1] : vector<8x256xf32> to vector<8xf32>
      %85 = vector.shape_cast %84 : vector<8xf32> to vector<8x1xf32>
      %86 = math.log %85 : vector<8x1xf32>
      %87 = arith.addf %74, %86 : vector<8x1xf32>
      %c2_i32_38 = arith.constant 2 : i32
      %88 = arith.cmpi sge, %arg10, %c2_i32_38 : i32
      %89 = arith.extui %88 : i1 to i32
      %c0_i32_39 = arith.constant 0 : i32
      %90 = arith.cmpi ne, %89, %c0_i32_39 : i32
      scf.if %90 {
        %c0_i32_45 = arith.constant 0 : i32
        %c0_i32_46 = arith.constant 0 : i32
        %102 = tpu.memref_slice %arg8[%28, %c0_i32_45, %c0_i32_46] : memref<2x8x256xf32, #tpu.memory_space<vmem>> -> memref<1x8x256xf32, #tpu.memory_space<vmem>>
        %103 = tpu.memref_squeeze %102 : memref<1x8x256xf32, #tpu.memory_space<vmem>> -> memref<8x256xf32, #tpu.memory_space<vmem>>
        %c0_i32_47 = arith.constant 0 : i32
        %104 = tpu.memref_slice %arg7[%0, %c0_i32_47] : memref<8x2048xf32, #tpu.memory_space<any>> -> memref<8x256xf32, #tpu.memory_space<any>>
        %105 = tpu.memref_slice %arg9[%28] : memref<2x!tpu.dma_semaphore, #tpu.memory_space<semaphore_mem>> -> memref<1x!tpu.dma_semaphore, #tpu.memory_space<semaphore_mem>>
        %106 = tpu.memref_squeeze %105 : memref<1x!tpu.dma_semaphore, #tpu.memory_space<semaphore_mem>> -> memref<!tpu.dma_semaphore, #tpu.memory_space<semaphore_mem>>
        tpu.wait_dma2 semaphore(%106 : memref<!tpu.dma_semaphore, #tpu.memory_space<semaphore_mem>>) src(%103 : memref<8x256xf32, #tpu.memory_space<vmem>>) dst(%104 : memref<8x256xf32, #tpu.memory_space<any>>)
      } else {
      }
      %91 = vector.broadcast %87 : vector<8x1xf32> to vector<8x256xf32>
      %92 = arith.subf %72, %91 : vector<8x256xf32>
      %93 = vector.shape_cast %92 : vector<8x256xf32> to vector<1x8x256xf32>
      %94 = arith.index_cast %28 : i32 to index
      %c0_40 = arith.constant 0 : index
      %c0_41 = arith.constant 0 : index
      %95 = vector.load %arg8[%94, %c0_40, %c0_41] : memref<2x8x256xf32, #tpu.memory_space<vmem>>, vector<1x8x256xf32>
      tpu.vector_store %arg8[%94, %c0_40, %c0_41], %93 {strides = array<i32>} : memref<2x8x256xf32, #tpu.memory_space<vmem>>, vector<1x8x256xf32>,
      %c256_i32_42 = arith.constant 256 : i32
      %96 = arith.muli %arg10, %c256_i32_42 : i32
      %c0_i32_43 = arith.constant 0 : i32
      %c0_i32_44 = arith.constant 0 : i32
      %97 = tpu.memref_slice %arg8[%28, %c0_i32_43, %c0_i32_44] : memref<2x8x256xf32, #tpu.memory_space<vmem>> -> memref<1x8x256xf32, #tpu.memory_space<vmem>>
      %98 = tpu.memref_squeeze %97 : memref<1x8x256xf32, #tpu.memory_space<vmem>> -> memref<8x256xf32, #tpu.memory_space<vmem>>
      %99 = tpu.memref_slice %arg7[%0, %96] : memref<8x2048xf32, #tpu.memory_space<any>> -> memref<8x256xf32, #tpu.memory_space<any>>
      %100 = tpu.memref_slice %arg9[%28] : memref<2x!tpu.dma_semaphore, #tpu.memory_space<semaphore_mem>> -> memref<1x!tpu.dma_semaphore, #tpu.memory_space<semaphore_mem>>
      %101 = tpu.memref_squeeze %100 : memref<1x!tpu.dma_semaphore, #tpu.memory_space<semaphore_mem>> -> memref<!tpu.dma_semaphore, #tpu.memory_space<semaphore_mem>>
      tpu.enqueue_dma source(%98 : memref<8x256xf32, #tpu.memory_space<vmem>>) target(%99 : memref<8x256xf32, #tpu.memory_space<any>>) target_semaphore(%101 : memref<!tpu.dma_semaphore, #tpu.memory_space<semaphore_mem>>)
      scf.yield %67, %65, %80 : vector<8x128xf32>, vector<8x128xf32>, vector<8x1xi32>
    }
    %c8_i32_7 = arith.constant 8 : i32
    %c1_i32_8 = arith.constant 1 : i32
    %c1_i32_9 = arith.constant 1 : i32
    %c0_i32_10 = arith.constant 0 : i32
    %c0_i32_11 = arith.constant 0 : i32
    %9 = tpu.memref_slice %arg8[%c1_i32_8, %c0_i32_10, %c0_i32_11] : memref<2x8x256xf32, #tpu.memory_space<vmem>> -> memref<1x8x256xf32, #tpu.memory_space<vmem>>
    %10 = tpu.memref_squeeze %9 : memref<1x8x256xf32, #tpu.memory_space<vmem>> -> memref<8x256xf32, #tpu.memory_space<vmem>>
    %c0_i32_12 = arith.constant 0 : i32
    %11 = tpu.memref_slice %arg7[%0, %c0_i32_12] : memref<8x2048xf32, #tpu.memory_space<any>> -> memref<8x256xf32, #tpu.memory_space<any>>
    %12 = tpu.memref_slice %arg9[%c1_i32_9] : memref<2x!tpu.dma_semaphore, #tpu.memory_space<semaphore_mem>> -> memref<1x!tpu.dma_semaphore, #tpu.memory_space<semaphore_mem>>
    %13 = tpu.memref_squeeze %12 : memref<1x!tpu.dma_semaphore, #tpu.memory_space<semaphore_mem>> -> memref<!tpu.dma_semaphore, #tpu.memory_space<semaphore_mem>>
    tpu.wait_dma2 semaphore(%13 : memref<!tpu.dma_semaphore, #tpu.memory_space<semaphore_mem>>) src(%10 : memref<8x256xf32, #tpu.memory_space<vmem>>) dst(%11 : memref<8x256xf32, #tpu.memory_space<any>>)
    %c0_i32_13 = arith.constant 0 : i32
    %c0_i32_14 = arith.constant 0 : i32
    %c0_i32_15 = arith.constant 0 : i32
    %c0_i32_16 = arith.constant 0 : i32
    %14 = tpu.memref_slice %arg8[%c0_i32_13, %c0_i32_15, %c0_i32_16] : memref<2x8x256xf32, #tpu.memory_space<vmem>> -> memref<1x8x256xf32, #tpu.memory_space<vmem>>
    %15 = tpu.memref_squeeze %14 : memref<1x8x256xf32, #tpu.memory_space<vmem>> -> memref<8x256xf32, #tpu.memory_space<vmem>>
    %c0_i32_17 = arith.constant 0 : i32
    %16 = tpu.memref_slice %arg7[%0, %c0_i32_17] : memref<8x2048xf32, #tpu.memory_space<any>> -> memref<8x256xf32, #tpu.memory_space<any>>
    %17 = tpu.memref_slice %arg9[%c0_i32_14] : memref<2x!tpu.dma_semaphore, #tpu.memory_space<semaphore_mem>> -> memref<1x!tpu.dma_semaphore, #tpu.memory_space<semaphore_mem>>
    %18 = tpu.memref_squeeze %17 : memref<1x!tpu.dma_semaphore, #tpu.memory_space<semaphore_mem>> -> memref<!tpu.dma_semaphore, #tpu.memory_space<semaphore_mem>>
    tpu.wait_dma2 semaphore(%18 : memref<!tpu.dma_semaphore, #tpu.memory_space<semaphore_mem>>) src(%15 : memref<8x256xf32, #tpu.memory_space<vmem>>) dst(%16 : memref<8x256xf32, #tpu.memory_space<any>>)
    return
  }
  func.func @transform_0(%arg0: i32) -> (i32, i32) {
    %c0_i32 = arith.constant 0 : i32
    %c0_i32_0 = arith.constant 0 : i32
    return %arg0, %c0_i32 : i32, i32
  }
  func.func @transform_1(%arg0: i32) -> (i32, i32) {
    %c0_i32 = arith.constant 0 : i32
    %c0_i32_0 = arith.constant 0 : i32
    %c0_i32_1 = arith.constant 0 : i32
    return %c0_i32, %c0_i32_0 : i32, i32
  }
  func.func @transform_2(%arg0: i32) -> (i32, i32) {
    %c0_i32 = arith.constant 0 : i32
    %c0_i32_0 = arith.constant 0 : i32
    %c0_i32_1 = arith.constant 0 : i32
    return %c0_i32, %c0_i32_0 : i32, i32
  }
  func.func @transform_3(%arg0: i32) -> (i32, i32) {
    %c0_i32 = arith.constant 0 : i32
    %c0_i32_0 = arith.constant 0 : i32
    %c0_i32_1 = arith.constant 0 : i32
    return %c0_i32, %c0_i32_0 : i32, i32
  }
  func.func @transform_4(%arg0: i32) -> (i32, i32) {
    %c0_i32 = arith.constant 0 : i32
    %c0_i32_0 = arith.constant 0 : i32
    %c0_i32_1 = arith.constant 0 : i32
    return %c0_i32, %c0_i32_0 : i32, i32
  }
  func.func @transform_5(%arg0: i32) -> (i32, i32) {
    %c0_i32 = arith.constant 0 : i32
    %c0_i32_0 = arith.constant 0 : i32
    %c0_i32_1 = arith.constant 0 : i32
    return %c0_i32, %c0_i32_0 : i32, i32
  }
}

</mosaic_0001>

<bundles_post_ra>
// kernel: tpu_custom_call.1
= control target key start
LH: loop header
LB: loop body
LE: loop exit
PB: predicated region body
PF: predicated region fallthrough
CT: control target
= control target key end

     0   :  { %11 = vsyncpa [#allocation5], 0  ;;  %s2043_s0 = inlined_call_operand.hbm [shape: f32[8,128], index: 0, kind: input, shape index: {}]   ;;  %s2044_s1 = inlined_call_operand.hbm [shape: bf16[256,128], index: 1, kind: input, shape index: {}]   ;;  %s2045_s2 = inlined_call_operand.hbm [shape: bf16[256,512], index: 2, kind: input, shape index: {}]   ;;  %s2046_s3 = inlined_call_operand.hbm [shape: f32[1,512], index: 3, kind: input, shape index: {}]   ;;  %s2047_s4 = inlined_call_operand.hbm [shape: bf16[128,256], index: 4, kind: input, shape index: {}]   ;;  %s2048_s5 = inlined_call_operand.vmem [shape: f32[1,256], index: 5, kind: input, shape index: {}]   ;;  %s2049_s6 = inlined_call_operand.hbm [shape: f32[8,2048], index: 6, kind: output, shape index: {}]  }
   0x1   :  { %12 = vsyncpa [#allocation7], 0  ;;  %s29_s23 = sshll.u32 %s2044_s1, 4  ;;  %s30_s23 = int_to_ptr.hbm [resolvable:$true] %s29_s23 }
   0x2   :  { %13 = vsyncpa [#allocation10], 0  ;;  %s1855_s24 = smov [#allocation6]   ;;  %s56_s28 = sshll.u32 %s2046_s3, 4  ;;  %s57_s28 = int_to_ptr.hbm [resolvable:$true] %s56_s28 }
   0x3   :  { %s31_s25 = sshll.u32 %s1855_s24, 4  ;;  %s1856_s29 = smov 64   ;;  %s32_s25 = int_to_ptr.vmem [resolvable:$true] %s31_s25 }
   0x4   :  { %s1857_s30 = smov 4   ;;  %s1858_s7 = smov [#allocation9]  }
   0x5   :  { %37 = dma.hbm_to_vmem [thread:$0]  %s30_s23, 2048, %s32_s25, [#allocation7], %s1856_s29, %s1856_s29, %s1857_s30  }
   0x6   :  { %s58_s8 = sshll.u32 %s1858_s7, 4  ;;  %s19_s11 = sshll.u32 %s2043_s0, 4  ;;  %s59_s8 = int_to_ptr.vmem [resolvable:$true] %s58_s8  ;;  %s20_s11 = int_to_ptr.hbm [resolvable:$true] %s19_s11 }
   0x7   :  { %61 = dma.hbm_to_vmem [thread:$0]  %s57_s28, 64, %s59_s8, [#allocation10]  }
   0x8   :  { %s42_s13 = sshll.u32 %s2045_s2, 4  ;;  %s1859_s14 = smov [#allocation4]   ;;  %s43_s13 = int_to_ptr.hbm [resolvable:$true] %s42_s13 }
   0x9   :  { %s21_s15 = sshll.u32 %s1859_s14, 4  ;;  %s1860_s3 = smov [#allocation8]   ;;  %s22_s15 = int_to_ptr.vmem [resolvable:$true] %s21_s15 }
   0xa   :  { %24 = dma.hbm_to_vmem [thread:$0]  %s20_s11, 128, %s22_s15, [#allocation5]  }
   0xb   :  { %s44_s16 = sshll.u32 %s1860_s3, 4  ;;  %s1861_s17 = smov 256   ;;  %s45_s16 = int_to_ptr.vmem [resolvable:$true] %s44_s16 }
   0xc   :  { %s1862_s18 = smov 16   ;;  %s66_s20 = sshll.u32 %s2047_s4, 4  ;;  %s67_s20 = int_to_ptr.hbm [resolvable:$true] %s66_s20 }
   0xd   :  { %50 = dma.hbm_to_vmem [thread:$0]  %s43_s13, 8192, %s45_s16, [#allocation7], %s1861_s17, %s1861_s17, %s1862_s18  }
   0xe   :  { %s1863_s21 = smov [#allocation11]   ;;  %s1864_s2 = smov 128  }
   0xf   :  { %s68_s22 = sshll.u32 %s1863_s21, 4  ;;  %s1865_s23 = smov 8   ;;  %s69_s22 = int_to_ptr.vmem [resolvable:$true] %s68_s22 }
  0x10   :  { %74 = dma.hbm_to_vmem [thread:$0]  %s67_s20, 2048, %s69_s22, [#allocation10], %s1864_s2, %s1864_s2, %s1865_s23  }
  0x11   :  { %1825 = dma.done.wait [#allocation5], 128  }
  0x12   :  { %1826 = vsyncadd [#allocation5], 4294967168 }
  0x13   :  { %1827 = dma.done.wait [#allocation7], 10240  }
  0x14   :  { %1828 = vsyncadd [#allocation7], 4294957056 }
  0x15   :  { %1829 = dma.done.wait [#allocation10], 2112  }
  0x16   :  { %1830 = vsyncadd [#allocation10], 4294965184  ;;  %v98_v0 = vlaneseq  ;;  %v1923_v3 = vld [vmem:[#allocation9] sm:$0xf]  ;;  %v1928_v4 = vld [vmem:[%s2048_s5] sm:$0x3] }
  0x17   :  { %v103_v5 = vld [vmem:[#allocation4] sm:$0xff]   ;;  %v1930_v6 = vmov 1   ;;  %v1932_v7 = vmov 0.0   ;;  %s1936_s25 = smov 0  }
  0x18   :  { %v1918_v1 = vand.u32 127, %v98_v0 }
  0x1a   :  { %v1921_v2 = vadd.s32 128, %v1918_v1 }
  0x1b LB: > { %v1506_v8 = vld [vmem:[#allocation6 + $0x38] sm:$0xff]  ;;  %v1505_v10 = vld [vmem:[#allocation6 + $0x30] sm:$0xff]  ;;  %v1504_v12 = vld [vmem:[#allocation6 + $0x28] sm:$0xff]  ;;  %vm125_vm0 = vcmp.eq.s32.totalorder %v1918_v1, %v1841_v6  ;;  %s114_s5 = ssub.s32 0, %s1853_s25  ;;  %p113_p0 = scmp.lt.s32.totalorder %s1853_s25, 0  ;;  %s1853_s25 = sphi %s1936_s25, %s109_s25   ;;  %v1849_v5 = vphi %v103_v5, %v1995_v5   ;;  %v1845_v7 = vphi %v1932_v7, %v1992_v7   ;;  %v1841_v6 = vphi %v1930_v6, %v999_v6  }
  0x1c   : > { %v1514_v9 = vld [vmem:[#allocation6 + $0x78] sm:$0xff]  ;;  %261 = vmatpush.bf16.msra.mxu0 %v1506_v8  ;;  %v1513_v11 = vld [vmem:[#allocation6 + $0x70] sm:$0xff]  ;;  %v1512_v13 = vld [vmem:[#allocation6 + $0x68] sm:$0xff]  ;;  %vm126_vm2 = vcmp.eq.s32.totalorder %v1921_v2, %v1841_v6  ;;  %v1866_v6 = vmov 1.0|1.0   ;;  %s1096_s26 = smin.u32 %s1853_s25, %s114_s5  ;;  %p1598_p2 = scmp.ge.s32.totalorder %s1853_s25, 2 }
  0x1d   : > { %274 = vmatpush.bf16.msra.mxu1 %v1514_v9  ;;  %v1411_v14 = vld [vmem:[#allocation8 + $0x1e0] sm:$0xf]  ;;  %v1577_v15 = vld [vmem:[#allocation8 + $0x1ec] sm:$0xf0]  ;;  %v1502_v31 = vld [vmem:[#allocation6 + $0x18] sm:$0xff]  ;;  %s116_s27 = sand.u32 1, %s1096_s26  }
  0x1e   : > { %v1412_v16 = vor.u32 %v1577_v15, %v1411_v14  ;;  %v1283_v17 = vld [vmem:[#allocation8 + $0xe0] sm:$0xf]  ;;  %v1545_v18 = vld [vmem:[#allocation8 + $0xec] sm:$0xf0]  ;;  %v1510_v32 = vld [vmem:[#allocation6 + $0x58] sm:$0xff]  ;;  %s117_s28 = ssub.s32 0, %s116_s27 }
  0x1f   : > { %v1284_v19 = vor.u32 %v1545_v18, %v1283_v17  ;;  %v1395_v20 = vld [vmem:[#allocation8 + $0x1c0] sm:$0xf]  ;;  %v1573_v23 = vld [vmem:[#allocation8 + $0x1cc] sm:$0xf0]  ;;  %v1500_v48 = vld [vmem:[#allocation6 + $0x8] sm:$0xff]  ;;  %s2055_s28 = smov (!%p113_p0, %s117_s28), %s116_s27 }
  0x20   : > { %262 = vmatpush.bf16.msra.mxu0 %v1505_v10  ;;  %v1503_v21 = vld [vmem:[#allocation6 + $0x20] sm:$0xff]  ;;  %695 = vmatpush.bf16.msra.mxu3 %v1412_v16  ;;  %v1396_v24 = vor.u32 %v1573_v23, %v1395_v20  ;;  %v1541_v26 = vld [vmem:[#allocation8 + $0xcc] sm:$0xf0]  ;;  %v1508_v49 = vld [vmem:[#allocation6 + $0x48] sm:$0xff]  ;;  %p1098_p1 = scmp.lt.s32.totalorder %s2055_s28, 0  ;;  %s123_s29 = sadd.s32 2, %s2055_s28 }
  0x21   : > { %275 = vmatpush.bf16.msra.mxu1 %v1513_v11  ;;  %v1511_v22 = vld [vmem:[#allocation6 + $0x60] sm:$0xff]  ;;  %682 = vmatpush.bf16.msra.mxu2 %v1284_v19  ;;  %v1569_v29 = vld [vmem:[#allocation8 + $0x1ac] sm:$0xf0]  ;;  %v1413_v51 = vld [vmem:[#allocation8 + $0x1f0] sm:$0xf0] }
  0x22   : > { %v1267_v25 = vld [vmem:[#allocation8 + $0xc0] sm:$0xf]  ;;  %v1537_v33 = vld [vmem:[#allocation8 + $0xac] sm:$0xf0]  ;;  %v1575_v50 = vld [vmem:[#allocation8 + $0x1e4] sm:$0xf]  ;;  %s2057_s29 = smov (!%p1098_p1, %s123_s29), %s2055_s28 }
  0x23   : > { %v1268_v27 = vor.u32 %v1541_v26, %v1267_v25  ;;  %v1379_v28 = vld [vmem:[#allocation8 + $0x1a0] sm:$0xf]  ;;  %v1565_v37 = vld [vmem:[#allocation8 + $0x18c] sm:$0xf0]  ;;  %v1543_v54 = vld [vmem:[#allocation8 + $0xe4] sm:$0xf]  ;;  %v1416_v63 = vor.u32 %v1575_v50, %v1413_v51 }
  0x24   : > { %263 = vmatpush.bf16.msra.mxu0 %v1504_v12  ;;  %v1251_v30 = vld [vmem:[#allocation8 + $0xa0] sm:$0xf]  ;;  %696 = vmatpush.bf16.msra.mxu3 %v1396_v24  ;;  %v1380_v34 = vor.u32 %v1569_v29, %v1379_v28  ;;  %v1533_v39 = vld [vmem:[#allocation8 + $0x8c] sm:$0xf0]  ;;  %v1285_v55 = vld [vmem:[#allocation8 + $0xf0] sm:$0xf0] }
  0x25   : > { %276 = vmatpush.bf16.msra.mxu1 %v1512_v13  ;;  %683 = vmatpush.bf16.msra.mxu2 %v1268_v27  ;;  %v1252_v35 = vor.u32 %v1537_v33, %v1251_v30  ;;  %v1363_v36 = vld [vmem:[#allocation8 + $0x180] sm:$0xf]  ;;  %v1501_v40 = vld [vmem:[#allocation6 + $0x10] sm:$0xff]  ;;  %vm1952_vm1 = vmpackc.low %vm125_vm0, %vm125_vm0  ;;  %v1288_v9 = vor.u32 %v1543_v54, %v1285_v55  ;;  %s2012_s30 = scalar_lea.sflag [#allocation3], %s2057_s29 }
  0x26   : > { %v1235_v38 = vld [vmem:[#allocation8 + $0x80] sm:$0xf]  ;;  %v1509_v41 = vld [vmem:[#allocation6 + $0x50] sm:$0xff]  ;;  %v1364_v42 = vor.u32 %v1565_v37, %v1363_v36  ;;  %v1571_v0 = vld [vmem:[#allocation8 + $0x1c4] sm:$0xf] }
  0x27   : > { %v1236_v43 = vor.u32 %v1533_v39, %v1235_v38  ;;  %v1347_v44 = vld [vmem:[#allocation8 + $0x160] sm:$0xf]  ;;  %v1561_v45 = vld [vmem:[#allocation8 + $0x16c] sm:$0xf0]  ;;  %v1397_v8 = vld [vmem:[#allocation8 + $0x1d0] sm:$0xf0] }
  0x28   : > { %264 = vmatpush.bf16.msra.mxu0 %v1503_v21  ;;  %697 = vmatpush.bf16.msra.mxu3 %v1380_v34  ;;  %v1219_v46 = vld [vmem:[#allocation8 + $0x60] sm:$0xf]  ;;  %v1529_v47 = vld [vmem:[#allocation8 + $0x6c] sm:$0xf0]  ;;  %v1348_v52 = vor.u32 %v1561_v45, %v1347_v44  ;;  %v1539_v10 = vld [vmem:[#allocation8 + $0xc4] sm:$0xf]  ;;  %v1400_v19 = vor.u32 %v1571_v0, %v1397_v8 }
  0x29   : > { %277 = vmatpush.bf16.msra.mxu1 %v1511_v22  ;;  %684 = vmatpush.bf16.msra.mxu2 %v1252_v35  ;;  %v1220_v53 = vor.u32 %v1529_v47, %v1219_v46  ;;  %v1331_v56 = vld [vmem:[#allocation8 + $0x140] sm:$0xf]  ;;  %v1557_v57 = vld [vmem:[#allocation8 + $0x14c] sm:$0xf0]  ;;  %v1269_v11 = vld [vmem:[#allocation8 + $0xd0] sm:$0xf0] }
  0x2a   : > { %v1203_v58 = vld [vmem:[#allocation8 + $0x40] sm:$0xf]  ;;  %v1525_v59 = vld [vmem:[#allocation8 + $0x4c] sm:$0xf0]  ;;  %v1332_v12 = vor.u32 %v1557_v57, %v1331_v56  ;;  %vm1962_vm3 = vmpackc.low %vm126_vm2, %vm126_vm2  ;;  %v1272_v22 = vor.u32 %v1539_v10, %v1269_v11 }
  0x2b   : > { %v1499_v60 = vld [vmem:[#allocation6] sm:$0xff]  ;;  %v1204_v13 = vor.u32 %v1525_v59, %v1203_v58  ;;  %v1553_v15 = vld [vmem:[#allocation8 + $0x12c] sm:$0xf0]  ;;  %v1381_v21 = vld [vmem:[#allocation8 + $0x1b0] sm:$0xf0] }
  0x2c   : > { %265 = vmatpush.bf16.msra.mxu0 %v1502_v31  ;;  %698 = vmatpush.bf16.msra.mxu3 %v1364_v42  ;;  %v1507_v61 = vld [vmem:[#allocation6 + $0x40] sm:$0xff]  ;;  %v1521_v17 = vld [vmem:[#allocation8 + $0x2c] sm:$0xf0]  ;;  %v1253_v24 = vld [vmem:[#allocation8 + $0xb0] sm:$0xf0] }
  0x2d   : > { %278 = vmatpush.bf16.msra.mxu1 %v1510_v32  ;;  %685 = vmatpush.bf16.msra.mxu2 %v1236_v43  ;;  %v1315_v14 = vld [vmem:[#allocation8 + $0x120] sm:$0xf]  ;;  %v1567_v20 = vld [vmem:[#allocation8 + $0x1a4] sm:$0xf]  ;;  %v1549_v28 = vld [vmem:[#allocation8 + $0x10c] sm:$0xf0] }
  0x2e   : > { %v1187_v16 = vld [vmem:[#allocation8 + $0x20] sm:$0xf]  ;;  %v1535_v23 = vld [vmem:[#allocation8 + $0xa4] sm:$0xf]  ;;  %v1316_v25 = vor.u32 %v1553_v15, %v1315_v14  ;;  %v1517_v30 = vld [vmem:[#allocation8 + $0xc] sm:$0xf0]  ;;  %v1384_v35 = vor.u32 %v1567_v20, %v1381_v21 }
  0x2f   : > { %v1188_v26 = vor.u32 %v1521_v17, %v1187_v16  ;;  %v1299_v27 = vld [vmem:[#allocation8 + $0x100] sm:$0xf]  ;;  %v1419_v31 = vld [vmem:[#allocation8 + $0x1e8] sm:$0xf]  ;;  %v1578_v32 = vld [vmem:[#allocation8 + $0x1f4] sm:$0xf0]  ;;  %v1256_v37 = vor.u32 %v1535_v23, %v1253_v24 }
  0x30   : > { %266 = vmatpush.bf16.msra.mxu0 %v1501_v40  ;;  %699 = vmatpush.bf16.msra.mxu3 %v1348_v52  ;;  %v1171_v29 = vld [vmem:[#allocation8] sm:$0xf]  ;;  %v1291_v33 = vld [vmem:[#allocation8 + $0xe8] sm:$0xf]  ;;  %v1546_v34 = vld [vmem:[#allocation8 + $0xf4] sm:$0xf0]  ;;  %v1420_v43 = vor.u32 %v1578_v32, %v1419_v31 }
  0x31   : > { %279 = vmatpush.bf16.msra.mxu1 %v1509_v41  ;;  %686 = vmatpush.bf16.msra.mxu2 %v1220_v53  ;;  %v1563_v36 = vld [vmem:[#allocation8 + $0x184] sm:$0xf]  ;;  %v1365_v38 = vld [vmem:[#allocation8 + $0x190] sm:$0xf0]  ;;  %v1300_v41 = vor.u32 %v1549_v28, %v1299_v27  ;;  %v1172_v42 = vor.u32 %v1517_v30, %v1171_v29  ;;  %v1292_v44 = vor.u32 %v1546_v34, %v1291_v33  ;;  %v1403_v45 = vld [vmem:[#allocation8 + $0x1c8] sm:$0xf] }
  0x32   : > { %v1531_v39 = vld [vmem:[#allocation8 + $0x84] sm:$0xf]  ;;  %v1237_v40 = vld [vmem:[#allocation8 + $0x90] sm:$0xf0]  ;;  %v1574_v46 = vld [vmem:[#allocation8 + $0x1d4] sm:$0xf0] }
  0x33   : > { %v1275_v47 = vld [vmem:[#allocation8 + $0xc8] sm:$0xf]  ;;  %v1559_v50 = vld [vmem:[#allocation8 + $0x164] sm:$0xf]  ;;  %v1240_v51 = vor.u32 %v1531_v39, %v1237_v40  ;;  %v1349_v52 = vld [vmem:[#allocation8 + $0x170] sm:$0xf0]  ;;  %v1404_v55 = vor.u32 %v1574_v46, %v1403_v45 }
  0x34   : > { %267 = vmatpush.bf16.msra.mxu0 %v1500_v48  ;;  %700 = vmatpush.bf16.msra.mxu3 %v1332_v12  ;;  %v1542_v48 = vld [vmem:[#allocation8 + $0xd4] sm:$0xf0]  ;;  %v1527_v53 = vld [vmem:[#allocation8 + $0x64] sm:$0xf]  ;;  %v1221_v54 = vld [vmem:[#allocation8 + $0x70] sm:$0xf0]  ;;  %v1352_v62 = vor.u32 %v1559_v50, %v1349_v52 }
  0x35   : > { %280 = vmatpush.bf16.msra.mxu1 %v1508_v49  ;;  %687 = vmatpush.bf16.msra.mxu2 %v1204_v13  ;;  %v1368_v49 = vor.u32 %v1563_v36, %v1365_v38  ;;  %v1276_v56 = vor.u32 %v1542_v48, %v1275_v47  ;;  %v1387_v57 = vld [vmem:[#allocation8 + $0x1a8] sm:$0xf]  ;;  %v1570_v58 = vld [vmem:[#allocation8 + $0x1b4] sm:$0xf0]  ;;  %v1224_v0 = vor.u32 %v1527_v53, %v1221_v54  ;;  %v1333_v8 = vld [vmem:[#allocation8 + $0x150] sm:$0xf0] }
  0x36   : > { %v1259_v59 = vld [vmem:[#allocation8 + $0xa8] sm:$0xf]  ;;  %v1205_v10 = vld [vmem:[#allocation8 + $0x50] sm:$0xf0]  ;;  %v1388_v11 = vor.u32 %v1570_v58, %v1387_v57  ;;  %v1551_v14 = vld [vmem:[#allocation8 + $0x124] sm:$0xf] }
  0x37   : > { %v1317_v15 = vld [vmem:[#allocation8 + $0x130] sm:$0xf0]  ;;  %v1519_v16 = vld [vmem:[#allocation8 + $0x24] sm:$0xf]  ;;  %v1293_v27 = vld [vmem:[#allocation8 + $0xf8] sm:$0xf0] }
  0x38   : > { %268 = vmatpush.bf16.msra.mxu0 %v1499_v60  ;;  %701 = vmatpush.bf16.msra.mxu3 %v1316_v25  ;;  %v1538_v60 = vld [vmem:[#allocation8 + $0xb4] sm:$0xf0]  ;;  %v1189_v17 = vld [vmem:[#allocation8 + $0x30] sm:$0xf0]  ;;  %v1320_v18 = vor.u32 %v1551_v14, %v1317_v15  ;;  %v1515_v23 = vld [vmem:[#allocation8 + $0x4] sm:$0xf] }
  0x39   : > { %281 = vmatpush.bf16.msra.mxu1 %v1507_v61  ;;  %688 = vmatpush.bf16.msra.mxu2 %v1188_v26  ;;  %v1972_v61 = vpack.c.bf16 %v1849_v5, %v1849_v5  ;;  %v1260_v12 = vor.u32 %v1538_v60, %v1259_v59  ;;  %v1301_v20 = vld [vmem:[#allocation8 + $0x110] sm:$0xf0]  ;;  %v1192_v21 = vor.u32 %v1519_v16, %v1189_v17  ;;  %v1421_v25 = vld [vmem:[#allocation8 + $0x1f8] sm:$0xf0]  ;;  %v1544_v26 = vld [vmem:[#allocation8 + $0xec] sm:$0xf] }
  0x3a   : > { %v1173_v24 = vld [vmem:[#allocation8 + $0x10] sm:$0xf0]  ;;  %v1572_v30 = vld [vmem:[#allocation8 + $0x1cc] sm:$0xf]  ;;  %v1296_v31 = vor.u32 %v1544_v26, %v1293_v27  ;;  %v1405_v32 = vld [vmem:[#allocation8 + $0x1d8] sm:$0xf0] }
  0x3b   : > { %1166 = vmatmul.msk.bf16.vlgmr.msra.gmra.mxu0 %vm1952_vm1, %v1866_v6  ;;  %v1540_v33 = vld [vmem:[#allocation8 + $0xcc] sm:$0xf]  ;;  %v1277_v34 = vld [vmem:[#allocation8 + $0xd8] sm:$0xf0]  ;;  %v1371_v46 = vld [vmem:[#allocation8 + $0x188] sm:$0xf] }
  0x3c   : > { %708 = vmatpush.bf16.msrb.mxu0 %v1288_v9  ;;  %1168 = vmatmul.msk.bf16.vlgmr.msra.gmra.mxu1 %vm1962_vm3, %v1866_v6  ;;  %v1523_v9 = vld [vmem:[#allocation8 + $0x44] sm:$0xf]  ;;  %v1176_v6 = vor.u32 %v1515_v23, %v1173_v24  ;;  %v1568_v36 = vld [vmem:[#allocation8 + $0x1ac] sm:$0xf]  ;;  %v1389_v38 = vld [vmem:[#allocation8 + $0x1b8] sm:$0xf0] }
  0x3d   : > { %721 = vmatpush.bf16.msrb.mxu1 %v1416_v63  ;;  %702 = vmatpush.bf16.msra.mxu3 %v1300_v41  ;;  %v1555_v63 = vld [vmem:[#allocation8 + $0x144] sm:$0xf]  ;;  %v1208_v5 = vor.u32 %v1523_v9, %v1205_v10  ;;  %v1536_v39 = vld [vmem:[#allocation8 + $0xac] sm:$0xf]  ;;  %v1261_v40 = vld [vmem:[#allocation8 + $0xb8] sm:$0xf0]  ;;  %v1392_v41 = vor.u32 %v1568_v36, %v1389_v38 }
  0x3e   : > { %689 = vmatpush.bf16.msra.mxu2 %v1172_v42  ;;  %v1336_v13 = vor.u32 %v1555_v63, %v1333_v8  ;;  %v1264_v42 = vor.u32 %v1536_v39, %v1261_v40  ;;  %v1566_v47 = vld [vmem:[#allocation8 + $0x194] sm:$0xf0]  ;;  %v1560_v48 = vld [vmem:[#allocation8 + $0x16c] sm:$0xf]  ;;  %v1357_v50 = vld [vmem:[#allocation8 + $0x178] sm:$0xf0] }
  0x3f   : > { %v1534_v52 = vld [vmem:[#allocation8 + $0x94] sm:$0xf0]  ;;  %v1360_v53 = vor.u32 %v1560_v48, %v1357_v50  ;;  %v1355_v58 = vld [vmem:[#allocation8 + $0x168] sm:$0xf]  ;;  %v1556_v60 = vld [vmem:[#allocation8 + $0x14c] sm:$0xf] }
  0x40   : > { %709 = vmatpush.bf16.msrb.mxu0 %v1272_v22  ;;  %703 = vmatmul.bf16.vlgmr.msra.gmra.mxu3 %v1972_v61  ;;  %v1576_v22 = vld [vmem:[#allocation8 + $0x1ec] sm:$0xf]  ;;  %v1562_v59 = vld [vmem:[#allocation8 + $0x174] sm:$0xf0]  ;;  %v1341_v63 = vld [vmem:[#allocation8 + $0x158] sm:$0xf0] }
  0x41   : > { %722 = vmatpush.bf16.msrb.mxu1 %v1400_v19  ;;  %747 = vmatpush.bf16.msrb.mxu3 %v1420_v43  ;;  %v1547_v19 = vld [vmem:[#allocation8 + $0x104] sm:$0xf]  ;;  %v1424_v29 = vor.u32 %v1576_v22, %v1421_v25  ;;  %v1564_v43 = vld [vmem:[#allocation8 + $0x18c] sm:$0xf]  ;;  %v1530_v8 = vld [vmem:[#allocation8 + $0x74] sm:$0xf0]  ;;  %v1344_v9 = vor.u32 %v1556_v60, %v1341_v63 }
  0x42   : > { %734 = vmatpush.bf16.msrb.mxu2 %v1292_v44  ;;  %v1304_v28 = vor.u32 %v1547_v19, %v1301_v20  ;;  %v1373_v44 = vld [vmem:[#allocation8 + $0x198] sm:$0xf0]  ;;  %v1339_v14 = vld [vmem:[#allocation8 + $0x148] sm:$0xf]  ;;  %v1552_v15 = vld [vmem:[#allocation8 + $0x12c] sm:$0xf] }
  0x43   : > { %v1376_v45 = vor.u32 %v1564_v43, %v1373_v44  ;;  %v1325_v17 = vld [vmem:[#allocation8 + $0x138] sm:$0xf0]  ;;  %v1526_v19 = vld [vmem:[#allocation8 + $0x54] sm:$0xf0]  ;;  %v1524_v22 = vld [vmem:[#allocation8 + $0x4c] sm:$0xf] }
  0x44   : > { %710 = vmatpush.bf16.msrb.mxu0 %v1256_v37  ;;  %v1280_v37 = vor.u32 %v1540_v33, %v1277_v34  ;;  %v1328_v20 = vor.u32 %v1552_v15, %v1325_v17  ;;  %v1213_v23 = vld [vmem:[#allocation8 + $0x58] sm:$0xf0]  ;;  %v1323_v24 = vld [vmem:[#allocation8 + $0x128] sm:$0xf]  ;;  %v1554_v26 = vld [vmem:[#allocation8 + $0x134] sm:$0xf0] }
  0x45   : > { %723 = vmatpush.bf16.msrb.mxu1 %v1384_v35  ;;  %748 = vmatpush.bf16.msrb.mxu3 %v1404_v55  ;;  %v1408_v35 = vor.u32 %v1572_v30, %v1405_v32  ;;  %v1532_v55 = vld [vmem:[#allocation8 + $0x8c] sm:$0xf]  ;;  %v1216_v25 = vor.u32 %v1524_v22, %v1213_v23  ;;  %v1195_v30 = vld [vmem:[#allocation8 + $0x28] sm:$0xf]  ;;  %v1197_v34 = vld [vmem:[#allocation8 + $0x38] sm:$0xf0] }
  0x46   : > { %735 = vmatpush.bf16.msrb.mxu2 %v1276_v56  ;;  %v1245_v56 = vld [vmem:[#allocation8 + $0x98] sm:$0xf0]  ;;  %v1548_v27 = vld [vmem:[#allocation8 + $0x10c] sm:$0xf]  ;;  %v1550_v36 = vld [vmem:[#allocation8 + $0x114] sm:$0xf0] }
  0x47   : > { %v1248_v57 = vor.u32 %v1532_v55, %v1245_v56  ;;  %v1520_v32 = vld [vmem:[#allocation8 + $0x2c] sm:$0xf]  ;;  %v1179_v38 = vld [vmem:[#allocation8 + $0x8] sm:$0xf]  ;;  %v1518_v39 = vld [vmem:[#allocation8 + $0x14] sm:$0xf0] }
  0x48   : > { %711 = vmatpush.bf16.msrb.mxu0 %v1240_v51  ;;  %v1243_v51 = vld [vmem:[#allocation8 + $0x88] sm:$0xf]  ;;  %v1516_v40 = vld [vmem:[#allocation8 + $0xc] sm:$0xf]  ;;  %v1180_v43 = vor.u32 %v1518_v39, %v1179_v38  ;;  %v355_v15 = vperm.slane %v1923_v3, 1 }
  0x49   : > { %724 = vmatpush.bf16.msrb.mxu1 %v1368_v49  ;;  %749 = vmatpush.bf16.msrb.mxu3 %v1388_v11  ;;  %v1372_v49 = vor.u32 %v1566_v47, %v1371_v46  ;;  %v1244_v54 = vor.u32 %v1534_v52, %v1243_v51  ;;  %v1528_v11 = vld [vmem:[#allocation8 + $0x6c] sm:$0xf]  ;;  %v1587_v23 = vld [vmem:[#allocation11 + $0x44] sm:$0xf]  ;;  %v1446_v39 = vld [vmem:[#allocation11 + $0x20] sm:$0xf] }
  0x4a   : > { %736 = vmatpush.bf16.msrb.mxu2 %v1260_v12  ;;  %v1229_v12 = vld [vmem:[#allocation8 + $0x78] sm:$0xf0]  ;;  %v1588_v22 = vld [vmem:[#allocation11 + $0x44] sm:$0xf0] }
  0x4c   : > { %712 = vmatpush.bf16.msrb.mxu0 %v1224_v0  ;;  %v1227_v0 = vld [vmem:[#allocation8 + $0x68] sm:$0xf] }
  0x4d   : > { %725 = vmatpush.bf16.msrb.mxu1 %v1352_v62  ;;  %750 = vmatpush.bf16.msrb.mxu3 %v1372_v49  ;;  %v1356_v62 = vor.u32 %v1562_v59, %v1355_v58  ;;  %v1228_v10 = vor.u32 %v1530_v8, %v1227_v0  ;;  %v1593_v58 = vld [vmem:[#allocation11 + $0x74] sm:$0xf]  ;;  %v1478_v0 = vld [vmem:[#allocation11 + $0x60] sm:$0xf]  ;;  %v1592_v8 = vld [vmem:[#allocation11 + $0x64] sm:$0xf0] }
  0x4e   : > { %737 = vmatpush.bf16.msrb.mxu2 %v1244_v54 }
  0x50   : > { %713 = vmatpush.bf16.msrb.mxu0 %v1208_v5  ;;  %v1558_v5 = vld [vmem:[#allocation8 + $0x154] sm:$0xf0] }
  0x51   : > { %726 = vmatpush.bf16.msrb.mxu1 %v1336_v13  ;;  %751 = vmatpush.bf16.msrb.mxu3 %v1356_v62  ;;  %v1232_v13 = vor.u32 %v1528_v11, %v1229_v12  ;;  %v1340_v16 = vor.u32 %v1558_v5, %v1339_v14  ;;  %v1488_v62 = vld [vmem:[#allocation11 + $0x78] sm:$0xf0]  ;;  %v1480_v11 = vld [vmem:[#allocation11 + $0x68] sm:$0xf0]  ;;  %v1590_v14 = vld [vmem:[#allocation11 + $0x54] sm:$0xf0] }
  0x52   : > { %738 = vmatpush.bf16.msrb.mxu2 %v1228_v10  ;;  %v1491_v63 = vor.u32 %v1593_v58, %v1488_v62  ;;  %v1479_v10 = vor.u32 %v1592_v8, %v1478_v0  ;;  %v1589_v5 = vld [vmem:[#allocation11 + $0x54] sm:$0xf]  ;;  %v1579_v58 = vld [vmem:[#allocation11 + $0x4] sm:$0xf] }
  0x54   : > { %714 = vmatpush.bf16.msrb.mxu0 %v1192_v21 }
  0x55   : > { %727 = vmatpush.bf16.msrb.mxu1 %v1320_v18  ;;  %v1211_v18 = vld [vmem:[#allocation8 + $0x48] sm:$0xf]  ;;  %752 = vmatpush.bf16.msrb.mxu3 %v1340_v16 }
  0x56   : > { %v1212_v21 = vor.u32 %v1526_v19, %v1211_v18  ;;  %v1472_v18 = vld [vmem:[#allocation11 + $0x58] sm:$0xf0] }
  0x57   : > { %v1475_v19 = vor.u32 %v1589_v5, %v1472_v18 }
  0x58   : > { %715 = vmatpush.bf16.msrb.mxu0 %v1176_v6  ;;  %739 = vmatpush.bf16.msrb.mxu2 %v1212_v21  ;;  %v1324_v6 = vor.u32 %v1554_v26, %v1323_v24  ;;  %v1462_v21 = vld [vmem:[#allocation11 + $0x40] sm:$0xf]  ;;  %v1464_v26 = vld [vmem:[#allocation11 + $0x48] sm:$0xf0] }
  0x59   : > { %728 = vmatpush.bf16.msrb.mxu1 %v1304_v28  ;;  %v1309_v28 = vld [vmem:[#allocation8 + $0x118] sm:$0xf0] }
  0x5a   : > { %753 = vmatpush.bf16.msrb.mxu3 %v1324_v6  ;;  %v354_v6 = vperm.slane %v1923_v3, 0 }
  0x5c   : > { %760 = vmatpush.bf16.msra.mxu0 %v1296_v31  ;;  %729 = vmatmul.bf16.vlgmr.msrb.gmra.mxu1 %v1972_v61  ;;  %v1522_v31 = vld [vmem:[#allocation8 + $0x34] sm:$0xf0] }
  0x5d   : > { %773 = vmatpush.bf16.msra.mxu1 %v1424_v29  ;;  %v1312_v29 = vor.u32 %v1548_v27, %v1309_v28  ;;  %v1196_v33 = vor.u32 %v1522_v31, %v1195_v30  ;;  %v1467_v27 = vor.u32 %v1587_v23, %v1464_v26  ;;  %v1586_v30 = vld [vmem:[#allocation11 + $0x34] sm:$0xf0]  ;;  %v1585_v31 = vld [vmem:[#allocation11 + $0x34] sm:$0xf] }
  0x5f   : > { %740 = vmatpush.bf16.msrb.mxu2 %v1196_v33 }
  0x60   : > { %761 = vmatpush.bf16.msra.mxu0 %v1280_v37  ;;  %v1200_v37 = vor.u32 %v1520_v32, %v1197_v34  ;;  %v1456_v34 = vld [vmem:[#allocation11 + $0x38] sm:$0xf0] }
  0x61   : > { %774 = vmatpush.bf16.msra.mxu1 %v1408_v35  ;;  %v1307_v35 = vld [vmem:[#allocation8 + $0x108] sm:$0xf] }
  0x63   : > { %741 = vmatpush.bf16.msrb.mxu2 %v1180_v43 }
  0x64   : > { %762 = vmatpush.bf16.msra.mxu0 %v1264_v42  ;;  %v1181_v42 = vld [vmem:[#allocation8 + $0x18] sm:$0xf0] }
  0x65   : > { %775 = vmatpush.bf16.msra.mxu1 %v1392_v41  ;;  %v1308_v41 = vor.u32 %v1550_v36, %v1307_v35  ;;  %v1184_v44 = vor.u32 %v1516_v40, %v1181_v42  ;;  %v1459_v36 = vor.u32 %v1585_v31, %v1456_v34  ;;  %v1584_v40 = vld [vmem:[#allocation11 + $0x24] sm:$0xf0] }
  0x66   : > { %v1447_v43 = vor.u32 %v1584_v40, %v1446_v39 }
  0x67   : > { %754 = vmatpush.bf16.msrb.mxu3 %v1308_v41  ;;  %v1583_v41 = vld [vmem:[#allocation11 + $0x24] sm:$0xf] }
  0x68   : > { %763 = vmatpush.bf16.msra.mxu0 %v1248_v57  ;;  %v1486_v57 = vld [vmem:[#allocation11 + $0x70] sm:$0xf] }
  0x69   : > { %776 = vmatpush.bf16.msra.mxu1 %v1376_v45 }
  0x6a   : > { %755 = vmatmul.bf16.vlgmr.msrb.gmra.mxu3 %v1972_v61 }
  0x6b   : > { %964 = vmatpush.bf16.msra.mxu3 %v1491_v63 }
  0x6c   : > { %764 = vmatpush.bf16.msra.mxu0 %v1232_v13  ;;  %v1470_v13 = vld [vmem:[#allocation11 + $0x50] sm:$0xf] }
  0x6d   : > { %777 = vmatpush.bf16.msra.mxu1 %v1360_v53  ;;  %v1471_v17 = vor.u32 %v1590_v14, %v1470_v13 }
  0x70   : > { %765 = vmatpush.bf16.msra.mxu0 %v1216_v25  ;;  %v1463_v25 = vor.u32 %v1588_v22, %v1462_v21 }
  0x71   : > { %778 = vmatpush.bf16.msra.mxu1 %v1344_v9  ;;  %v1591_v9 = vld [vmem:[#allocation11 + $0x64] sm:$0xf] }
  0x72   : > { %v1483_v12 = vor.u32 %v1591_v9, %v1480_v11 }
  0x74   : > { %766 = vmatpush.bf16.msra.mxu0 %v1200_v37  ;;  %965 = vmatpush.bf16.msra.mxu3 %v1483_v12  ;;  %v356_v12 = vperm.slane %v1923_v3, 2 }
  0x75   : > { %779 = vmatpush.bf16.msra.mxu1 %v1328_v20 }
  0x78   : > { %767 = vmatpush.bf16.msra.mxu0 %v1184_v44  ;;  %966 = vmatpush.bf16.msra.mxu3 %v1475_v19  ;;  %v1448_v44 = vld [vmem:[#allocation11 + $0x28] sm:$0xf0] }
  0x79   : > { %780 = vmatpush.bf16.msra.mxu1 %v1312_v29  ;;  %v1454_v29 = vld [vmem:[#allocation11 + $0x30] sm:$0xf] }
  0x7a   : > { %v1455_v33 = vor.u32 %v1586_v30, %v1454_v29 }
  0x7c   : > { %781 = vmatmul.bf16.vlgmr.msra.gmra.mxu1 %v1972_v61  ;;  %v1594_v61 = vld [vmem:[#allocation11 + $0x74] sm:$0xf0]  ;;  %967 = vmatpush.bf16.msra.mxu3 %v1467_v27 }
  0x7d   : > { %v1487_v60 = vor.u32 %v1594_v61, %v1486_v57  ;;  %v1580_v61 = vld [vmem:[#allocation11 + $0x4] sm:$0xf0] }
  0x80   : > { %968 = vmatpush.bf16.msra.mxu3 %v1459_v36 }
  0xb8   : > { %v270_v45 = vpop.f32.mrf.mxu0 }
  0xb9   : > { %v283_v46 = vpop.f32.mrf.mxu1 }
  0xba   : > { %v284_v47 = vadd.f32 %v283_v46, %v270_v45  ;;  %v357_v45 = vperm.slane %v1923_v3, 3  ;;  %v1451_v46 = vor.u32 %v1583_v41, %v1448_v44 }
  0xbc   : > { %v287_v48 = vpack.c.bf16 %v284_v47, %v284_v47  ;;  %969 = vmatpush.bf16.msra.mxu3 %v1451_v46 }
  0xbe   : > { %690 = vmatmul.bf16.vlgmr.msra.gmra.mxu2 %v287_v48  ;;  %716 = vmatmul.bf16.vlgmr.msrb.gmra.mxu0 %v287_v48 }
  0xbf   : > { %951 = vmatpush.bf16.msra.mxu2 %v1487_v60 }
  0xc0   : > { %v272_v49 = vpop.f32.mrf.mxu0 }
  0xc1   : > { %v285_v50 = vpop.f32.mrf.mxu1  ;;  %v1582_v49 = vld [vmem:[#allocation11 + $0x14] sm:$0xf0] }
  0xc3   : > { %v1978_v51 = vpop.f32.mrf.mxu3  ;;  %952 = vmatpush.bf16.msra.mxu2 %v1479_v10 }
  0xc7   : > { %953 = vmatpush.bf16.msra.mxu2 %v1471_v17 }
  0xcb   : > { %v706_v52 = vpop.f32.mrf.mxu3  ;;  %954 = vmatpush.bf16.msra.mxu2 %v1463_v25 }
  0xcc   : > { %v1581_v52 = vld [vmem:[#allocation11 + $0x14] sm:$0xf] }
  0xce   : > { %742 = vmatmul.bf16.vlgmr.msrb.gmra.mxu2 %v287_v48  ;;  %768 = vmatmul.bf16.vlgmr.msra.gmra.mxu0 %v287_v48  ;;  %v1438_v48 = vld [vmem:[#allocation11 + $0x10] sm:$0xf] }
  0xcf   : > { %955 = vmatpush.bf16.msra.mxu2 %v1455_v33  ;;  %v1439_v50 = vor.u32 %v1582_v49, %v1438_v48 }
  0xd3   : > { %956 = vmatpush.bf16.msra.mxu2 %v1447_v43 }
  0xd7   : > { %957 = vmatpush.bf16.msra.mxu2 %v1439_v50 }
  0xd9   : > { %v730_v53 = vpop.f32.mrf.mxu1 }
  0xe1   : > { %v732_v54 = vpop.f32.mrf.mxu1 }
  0xe2   : > { %v1430_v54 = vld [vmem:[#allocation11] sm:$0xf] }
  0xe3   : > { %v1431_v63 = vor.u32 %v1580_v61, %v1430_v54  ;;  %v867_v54 = vperm.slane %v1928_v4, 0 }
  0xe5   : > { %958 = vmatpush.bf16.msra.mxu2 %v1431_v63 }
  0xed   : > { %v1982_v59 = vpop.f32.mrf.mxu3 }
  0xf5   : > { %v758_v16 = vpop.f32.mrf.mxu3 }
  0xf9   : > { %v1980_v55 = vpop.f32.mrf.mxu1 }
 0x101   : > { %v784_v56 = vpop.f32.mrf.mxu1 }
 0x13b   : > { %v717_v20 = vpop.f32.mrf.mxu0 }
 0x13c   : > { %v718_v24 = vadd.f32 %v717_v20, %v355_v15 }
 0x13e   : > { %v731_v28 = vadd.f32 %v730_v53, %v718_v24  ;;  %v1440_v53 = vld [vmem:[#allocation11 + $0x18] sm:$0xf0] }
 0x13f   : > { %v1443_v57 = vor.u32 %v1581_v52, %v1440_v53 }
 0x140   : > { %v1426_v32 = vmul.f32 -1.442695, %v731_v28 }
 0x141   : > { %v691_v35 = vpop.f32.mrf.mxu2  ;;  %970 = vmatpush.bf16.msra.mxu3 %v1443_v57 }
 0x142   : > { %1643 = vpow2.f32 %v1426_v32  ;;  %v692_v37 = vadd.f32 %v691_v35, %v354_v6 }
 0x143   : > { %v719_v38 = vpop.f32.mrf.mxu0 }
 0x144   : > { %v705_v42 = vadd.f32 %v1978_v51, %v692_v37  ;;  %v1432_v51 = vld [vmem:[#allocation11 + $0x8] sm:$0xf0] }
 0x145   : > { %v1435_v8 = vor.u32 %v1579_v58, %v1432_v51 }
 0x146   : > { %v1425_v47 = vmul.f32 -1.442695, %v705_v42 }
 0x147   : > { %971 = vmatpush.bf16.msra.mxu3 %v1435_v8 }
 0x148   : > { %v1644_v56 = vpop.eup %1643  ;;  %1645 = vpow2.f32 %v1425_v47 }
 0x149   : > { %v808_v60 = vadd.f32 1.0, %v1644_v56  ;;  %v693_v62 = vpop.f32.mrf.mxu2  ;;  %v868_v56 = vperm.slane %v1928_v4, 1 }
 0x14b   : > { %1647 = vrcp.f32 %v808_v60  ;;  %v769_v0 = vpop.f32.mrf.mxu0  ;;  %v820_v25 = vand.u32 2147483648, %v808_v60  ;;  %vm814_vm5 = vweird.f32 %v808_v60  ;;  %v818_v6 = vand.u32 2147483647, %v808_v60 }
 0x14c   : > { %v770_v9 = vadd.f32 %v769_v0, %v357_v45 }
 0x14d   : > { %vm819_vm9 = vcmp.eq.f32.partialorder %v818_v6, 8.507059e+37 }
 0x14e   : > { %v1646_v10 = vpop.eup %1645  ;;  %v783_v11 = vadd.f32 %v1980_v55, %v770_v9 }
 0x14f   : > { %v789_v13 = vadd.f32 1.0, %v1646_v10 }
 0x150   : > { %v1427_v14 = vmul.f32 -1.442695, %v783_v11 }
 0x151   : > { %v1648_v5 = vpop.eup %1647  ;;  %1649 = vrcp.f32 %v789_v13  ;;  %v743_v15 = vpop.f32.mrf.mxu2  ;;  %v801_v29 = vand.u32 2147483648, %v789_v13  ;;  %v799_v31 = vand.u32 2147483647, %v789_v13  ;;  %vm795_vm8 = vweird.f32 %v789_v13 }
 0x152   : > { %v810_v16 = vmul.f32 %v1648_v5, %v808_v60  ;;  %1651 = vpow2.f32 %v1427_v14  ;;  %v744_v17 = vadd.f32 %v743_v15, %v356_v12  ;;  %vm815_vm4 = vweird.f32 %v1648_v5 }
 0x153   : > { %v771_v18 = vpop.f32.mrf.mxu0  ;;  %vm816_vm6 = vmor %vm814_vm5, %vm815_vm4  ;;  %v802_v34 = vor.u32 1.1754944e-38, %v801_v29  ;;  %vm800_vm11 = vcmp.eq.f32.partialorder %v799_v31, 8.507059e+37 }
 0x154   : > { %v811_v19 = vsub.f32 1.0, %v810_v16  ;;  %v757_v21 = vadd.f32 %v1982_v59, %v744_v17  ;;  %v821_v59 = vor.u32 1.1754944e-38, %v820_v25 }
 0x156   : > { %v812_v20 = vmul.f32 %v1648_v5, %v811_v19  ;;  %1653 = vtanh.f32 %v757_v21 }
 0x157   : > { %v1650_v22 = vpop.eup %1649 }
 0x158   : > { %v1652_v23 = vpop.eup %1651  ;;  %v791_v55 = vmul.f32 %v1650_v22, %v789_v13  ;;  %v813_v24 = vadd.f32 %v1648_v5, %v812_v20  ;;  %vm796_vm7 = vweird.f32 %v1650_v22 }
 0x159   : > { %v828_v26 = vadd.f32 1.0, %v1652_v23  ;;  %v745_v27 = vpop.f32.mrf.mxu2  ;;  %vm797_vm10 = vmor %vm795_vm8, %vm796_vm7 }
 0x15a   : > { %v792_v28 = vsub.f32 1.0, %v791_v55  ;;  %v817_v32 = vsel %vm816_vm6, %v1648_v5, %v813_v24 }
 0x15b   : > { %1655 = vrcp.f32 %v828_v26  ;;  %v822_v35 = vsel %vm819_vm9, %v821_v59, %v817_v32  ;;  %v840_v44 = vand.u32 2147483648, %v828_v26  ;;  %v838_v46 = vand.u32 2147483647, %v828_v26 }
 0x15c   : > { %v793_v30 = vmul.f32 %v1650_v22, %v792_v28  ;;  %v1654_v36 = vpop.eup %1653  ;;  %v844_v41 = vmul.f32 %v1845_v7, %v822_v35  ;;  %vm834_vm13 = vweird.f32 %v828_v26 }
 0x15d   : > { %v841_v48 = vor.u32 1.1754944e-38, %v840_v44  ;;  %vm839_vm15 = vcmp.eq.f32.partialorder %v838_v46, 8.507059e+37 }
 0x15e   : > { %v794_v33 = vadd.f32 %v1650_v22, %v793_v30 }
 0x160   : > { %v798_v37 = vsel %vm797_vm10, %v1650_v22, %v794_v33 }
 0x161   : > { %v1656_v38 = vpop.eup %1655  ;;  %v803_v39 = vsel %vm800_vm11, %v802_v34, %v798_v37 }
 0x162   : > { %v830_v40 = vmul.f32 %v1656_v38, %v828_v26  ;;  %v845_v42 = vmul.f32 %v1654_v36, %v803_v39  ;;  %vm835_vm12 = vweird.f32 %v1656_v38 }
 0x163   : > { %vm836_vm14 = vmor %vm834_vm13, %vm835_vm12 }
 0x164   : > { %v831_v43 = vsub.f32 1.0, %v830_v40  ;;  %v1992_v7 = vadd.f32 %v845_v42, %v844_v41  }
 0x166   : > { %1657 = vtanh.f32 %v1992_v7  ;;  %v832_v45 = vmul.f32 %v1656_v38, %v831_v43 }
 0x168   : > { %v833_v47 = vadd.f32 %v1656_v38, %v832_v45 }
 0x16a   : > { %v837_v49 = vsel %vm836_vm14, %v1656_v38, %v833_v47 }
 0x16b   : > { %v842_v50 = vsel %vm839_vm15, %v841_v48, %v837_v49 }
 0x16c   : > { %v1658_v52 = vpop.eup %1657 }
 0x16d   : > { %v1995_v5 = vmul.f32 %v1658_v52, %v842_v50  }
 0x16f   : > { %v849_v53 = vpack.c.bf16 %v1995_v5, %v1995_v5 }
 0x171   : > { %959 = vmatmul.bf16.vlgmr.msra.gmra.mxu2 %v849_v53  ;;  %972 = vmatmul.bf16.vlgmr.msra.gmra.mxu3 %v849_v53 }
 0x1f4   : > { %v960_v57 = vpop.f32.mrf.mxu2  ;;  %v973_v61 = vpop.f32.mrf.mxu3 }
 0x1f5   : > { %v961_v58 = vadd.f32 %v960_v57, %v867_v54  ;;  %v2001_v51 = vadd.f32 %v973_v61, %v868_v56 }
 0x1f7   : > { %v977_v60 = vmax.f32 %v961_v58, %v2001_v51 }
 0x1f9   : > { %978 = vmax.xlane.f32.xlu0 %v977_v60 }
 0x1fc   : > { %v962_v62 = vpop.f32.mrf.mxu2  ;;  %v975_v63 = vpop.f32.mrf.mxu3 }
 0x26c   : > { %v979_v0 = vpop.xlane.xlu0 %978 }
 0x26d   : > { %vm980_vm0 = vcmp.eq.f32.partialorder %v961_v58, %v979_v0  ;;  %vm981_vm1 = vcmp.eq.f32.partialorder %v2001_v51, %v979_v0  ;;  %v1000_v8 = vsub.f32 %v961_v58, %v979_v0  ;;  %v1001_v9 = vsub.f32 %v2001_v51, %v979_v0 }
 0x26e   : > { %v982_v10 = vsel %vm980_vm0, %v1918_v1, 256  ;;  %v983_v11 = vsel %vm981_vm1, %v1921_v2, 256 }
 0x26f   : > { %vm984_vm2 = vcmp.lt.s32.totalorder %v982_v10, %v983_v11  ;;  %v1002_v12 = vmul.f32 1.442695, %v1000_v8  ;;  %v1004_v13 = vmul.f32 1.442695, %v1001_v9 }
 0x270   : > { %v985_v14 = vsel %vm984_vm2, %v982_v10, %v983_v11 }
 0x271   : > { %v987_v15 = vshra.s32 %v985_v14, 16  ;;  %1659 = vpow2.f32 %v1002_v12  ;;  %v986_v20 = vand.u32 65535, %v985_v14 }
 0x272   : > { %1661 = vpow2.f32 %v1004_v13 }
 0x273   : > { %v989_v16 = vcvt.s32.f32 %v987_v15  ;;  %v988_v22 = vcvt.s32.f32 %v986_v20 }
 0x275   : > { %990 = vmin.xlane.f32.xlu0 %v989_v16 }
 0x277   : > { %v1660_v17 = vpop.eup %1659 }
 0x278   : > { %v1662_v18 = vpop.eup %1661 }
 0x279   : > { %v1006_v19 = vadd.f32 %v1662_v18, %v1660_v17 }
 0x27b   : > { %1007 = vadd.xlane.f32.xlu1 %v1006_v19 }
 0x2e8   : > { %v991_v21 = vpop.xlane.xlu0 %990 }
 0x2e9   : > { %vm992_vm3 = vcmp.eq.f32.partialorder %v989_v16, %v991_v21  ;;  %v997_v27 = vcvt.f32.s32 %v991_v21 }
 0x2ea   : > { %v993_v23 = vsel %vm992_vm3, %v988_v22, inf }
 0x2eb   : > { %994 = vmin.xlane.f32.xlu1 %v993_v23  ;;  %v998_v6 = vshll.u32 %v997_v27, 16 }
 0x2ee   : > { %v1008_v55 = vpop.xlane.xlu1 %1007 }
 0x2ef   : > { %1663 = vlog2.f32 %v1008_v55 }
 0x2f5   : > { %v1664_v24 = vpop.eup %1663 }
 0x2f6   : > { %v1010_v25 = vmul.f32 0.6931472, %v1664_v24 }
 0x2f8   : > { %v1011_v26 = vadd.f32 %v1010_v25, %v979_v0 }
 0x35e   : > { %v995_v28 = vpop.xlane.xlu1 %994 }
 0x35f   : > { %v996_v29 = vcvt.f32.s32 %v995_v28 }
 0x361   : > { %v999_v6 = vadd.s32 %v998_v6, %v996_v29  }
 0x362   : > { %1832 = dma.done.wait (%p1598_p2), %s2012_s30, 256 }
 0x363   : > { %1834 = vsyncadd (%p1598_p2), %s2012_s30, 4294967040  ;;  %v1021_v30 = vsub.f32 %v961_v58, %v1011_v26  ;;  %s1595_s7 = sshll.u32 %s2057_s29, 4  ;;  %v1022_v31 = vsub.f32 %v2001_v51, %v1011_v26  ;;  %s1495_s8 = sshll.u32 %s1853_s25, 8 }
 0x364   : > { %s1029_s9 = sshra.s32 %s1495_s8, 7  ;;  %s1025_s10 = scalar_lea.vmem [#allocation2], %s1595_s7 }
 0x365   : > { %1026 = vst [vmem:[%s1025_s10] sm:$0xff] %v1021_v30  ;;  %s1045_s11 = sshll.u32 %s1025_s10, 4  ;;  %s1496_s1 = sshll.u32 %s1029_s9, 3  ;;  %s1046_s11 = int_to_ptr.vmem [resolvable:$true] %s1045_s11 }
 0x366   : > { %1027 = vst [vmem:[%s1025_s10 + $0x8] sm:$0xff] %v1022_v31  ;;  %s1036_s14 = scalar_lea.hbm %s2049_s6, %s1496_s1  ;;  %s1785_s3 = sshra.s32 %s1046_s11, 4  ;;  %s1786_s3 = int_to_ptr.vmem [resolvable:$true] %s1785_s3 }
 0x367   : > { %s1047_s15 = sshll.u32 %s1036_s14, 4  ;;  %s1787_s16 = scalar_lea.vmem %s1786_s3, 16  ;;  %s1048_s15 = int_to_ptr.hbm [resolvable:$true] %s1047_s15 }
 0x368   : > { %p1788_p3 = scmp.ne.s32.totalorder %s1786_s3, %s1787_s16  ;;  %s1867_s17 = smov [#allocation2]  }
 0x369   : > { %s1789_s18 = scalar_lea.vmem %s1867_s17, 32  ;;  %p1790_p4 = scmp.lt.s32.totalorder %s1786_s3, [#allocation2] }
 0x36a   : > { %p1791_p5 = scmp.lt.s32.totalorder %s1789_s18, %s1787_s16 }
 0x36c   : > { %p1792_p6 = por %p1791_p5, %p1790_p4 }
 0x36e   : > { %p1793_p7 = pnand %p1792_p6, %p1788_p3 }
 0x370   : > { %1796 = shalt.err (!%p1793_p7)  }
 0x371   : > { %s1797_s19 = sshra.s32 %s1048_s15, 4  ;;  %s1801_s22 = scalar_lea.hbm %s2049_s6, 128  ;;  %s1798_s19 = int_to_ptr.hbm [resolvable:$true] %s1797_s19 }
 0x372   : > { %s1799_s0 = scalar_lea.hbm %s1798_s19, 16  ;;  %p1802_p9 = scmp.lt.s32.totalorder %s1798_s19, %s2049_s6 }
 0x373   : > { %p1800_p8 = scmp.ne.s32.totalorder %s1798_s19, %s1799_s0  ;;  %p1803_p10 = scmp.lt.s32.totalorder %s1801_s22, %s1799_s0 }
 0x375   : > { %p1804_p11 = por %p1803_p10, %p1802_p9 }
 0x377   : > { %p1805_p12 = pnand %p1804_p11, %p1800_p8 }
 0x379   : > { %1808 = shalt.err (!%p1805_p12)  }
 0x37a   : > { %1050 = dma.vmem_to_hbm [thread:$0]  %s1046_s11, 256, %s1048_s15, %s2012_s30 }
 0x37b   : > { %s109_s25 = sadd.s32 1, %s1853_s25  }
 0x37c   : > { %p106_p13 = scmp.ge.s32.totalorder %s109_s25, 8  }
 0x37e   :  { %108 = sbr.rel (!%p106_p13) target bundleno = 27 (0x1b), region = 77 }
 0x383   :  { %1835 = dma.done.wait [#allocation3 + $0x1], 256 }
 0x384   :  { %1836 = vsyncadd [#allocation3 + $0x1], 4294967040 }
 0x385   :  { %1837 = dma.done.wait [#allocation3], 256 }
 0x386   :  { %1838 = vsyncadd [#allocation3], 4294967040 }
 0x387   :  { %1058 = vsyncpa [#allocation5], 1 }
 0x388   :  { %1059 = vsyncpa [#allocation7], 1 }
 0x389   :  { %1060 = vsyncpa [#allocation10], 1 }
 0x38a   :  { %1061 = vsyncmov [#allocation3] }
 0x38d   :  { %s1062_s4 = vpop.sfrf %1061 }
 0x38e   :  { %p1497_p0 = scmp.ne.s32.totalorder %s1062_s4, 0 }
 0x390   :  { %1066 = shalt.err (%p1497_p0)  }
 0x391   :  { %1068 = vsyncmov [#allocation3 + $0x1] }
 0x394   :  { %s1069_s24 = vpop.sfrf %1068 }
 0x395   :  { %p1498_p1 = scmp.ne.s32.totalorder %s1069_s24, 0 }
 0x397   :  { %1073 = shalt.err (%p1498_p1)  }

</bundles_post_ra>
